<compile_context>
chip_gen: v7x
topology: tpu7x:2x2x1
jax: 0.10.0
libtpu: 0.0.40
codegen_flags: <defaults>
</compile_context>

<pallas_src>
import jax
import jax.numpy as jnp
from jax.experimental import pallas as pl
from jax.experimental.pallas import tpu as pltpu


def atten_kernel(ebd_ref, w_ref, b_ref, feat_ref, ext_ref, out_ref):
    """One grid step processes a block of Bb batch elements.

    ebd_ref : (Bb, Q, E)  label embeddings           (matmul dtype)
    w_ref   : (E, H)      shared transQ weight       (matmul dtype, grid-invariant)
    b_ref   : (1, 1, H)   shared transQ bias         (f32, grid-invariant)
    feat_ref: (Bb, S, H)  features                   (matmul dtype)
    ext_ref : (Bb, 1, S)  precomputed (mask-1)*1e4   (f32)
    out_ref : (Bb, Q, H)  attended features          (output dtype)
    """
    Bb, Q, E = ebd_ref.shape
    H = w_ref.shape[1]

    feat = feat_ref[...]                              # (Bb, S, H)
    ext = ext_ref[...]                                # (Bb, 1, S) f32

    # transQ: Linear(E -> H) as one 2-D dot with M = Bb*Q rows (good MXU row
    # occupancy, no replicated W), f32 accumulation.
    attn = jnp.dot(ebd_ref[...].reshape(Bb * Q, E), w_ref[...],
                   preferred_element_type=jnp.float32).reshape(Bb, Q, H)
    attn = attn + b_ref[...]                          # (Bb, Q, H) f32

    # Scores contract the shared last axis directly (no feat.T / XLU transpose).
    scores = jnp.einsum("bqh,bsh->bqs", attn.astype(feat.dtype), feat,
                        preferred_element_type=jnp.float32)   # (Bb,Q,S) f32
    scores = scores + ext                             # additive -1e4 mask, f32

    # Numerically stable softmax over the sequence axis (all f32).
    scores = scores - jnp.max(scores, axis=-1, keepdims=True)
    p = jnp.exp(scores)
    inv = pl.reciprocal(jnp.sum(p, axis=-1, keepdims=True), approx=True)  # EUP
    p = p * inv

    # Attended features, f32 accumulation.
    out = jnp.einsum("bqs,bsh->bqh", p.astype(feat.dtype), feat,
                     preferred_element_type=jnp.float32)      # (Bb,Q,H) f32

    # TODO(synk): H < 128 lanes -> masked partial stores; a lane-dense (Bb, Q*H)
    # output would need an in-kernel minor-dim merge relayout, so the flatten
    # stays in the (free) wrapper reshape.
    out_ref[...] = out.astype(out_ref.dtype)


def _largest_divisor_at_most(n, cap):
    cap = max(1, min(cap, n))
    for d in range(cap, 0, -1):
        if n % d == 0:
            return d
    return 1


def _choose_block_b(B, S, H, Q, E, in_itemsize, out_itemsize, block_b,
                    vmem_budget_bytes):
    """Pick the batch block Bb and return (Bb, per-block-bytes fn)."""

    def block_bytes(Bb):
        feat = 2 * Bb * S * H * in_itemsize          # double-buffered input
        ebd = 2 * Bb * Q * E * in_itemsize
        ext = 2 * Bb * S * 4
        out = 2 * Bb * Q * H * out_itemsize
        interm = Bb * Q * S * 4 + 2 * Bb * Q * H * 4  # scores + attn/out f32
        return feat + ebd + ext + out + interm

    if block_b is None:
        # Biggest block that fits the VMEM budget, but keep >= 2 grid steps so
        # the "parallel" axis can split across the 2 TCs on v7x.
        cap = B if B < 2 else max(1, B // 2)
        per = max(1, block_bytes(1))
        bb_budget = max(1, vmem_budget_bytes // per)
        Bb = min(cap, bb_budget)
        # Still aim for >= 256 MXU rows per step if the budget allows it.
        Bb = max(1, min(Bb, max(Bb, -(-256 // max(Q, 1)))))
    else:
        Bb = max(1, min(block_b, B))

    # Avoid any wrapper-side jnp.pad: round Bb down to a divisor of B.
    return _largest_divisor_at_most(B, Bb), block_bytes


def atten_forward(features, ebd, attention_mask, w, b, *, block_b=None,
                  matmul_dtype=jnp.bfloat16, feat_buffers=None,
                  vmem_budget_bytes=40 << 20):
    """features: (B,S,H); ebd: (B,Q,E); attention_mask: (B,S); w: (E,H); b: (H,).

    Returns (B, Q*H) in features.dtype.  matmul_dtype (default bf16) is used
    for the matmul operands only; accumulation, mask add and softmax are f32.
    """
    B, S, H = features.shape
    _, Q, E = ebd.shape
    out_dtype = features.dtype

    if matmul_dtype is not None:
        features = features.astype(matmul_dtype)
        ebd = ebd.astype(matmul_dtype)
        w = w.astype(matmul_dtype)

    # Extended mask precomputed once: scores + ext == scores + (1-m)*-1e4.
    ext = ((attention_mask.astype(jnp.float32) - 1.0) * 10000.0).reshape(B, 1, S)
    b3 = b.astype(jnp.float32).reshape(1, 1, H)

    in_itemsize = jnp.dtype(features.dtype).itemsize
    out_itemsize = jnp.dtype(out_dtype).itemsize
    Bb, block_bytes_fn = _choose_block_b(B, S, H, Q, E, in_itemsize,
                                         out_itemsize, block_b,
                                         vmem_budget_bytes)
    grid = B // Bb

    feat_spec_kwargs = {}
    if feat_buffers is not None and feat_buffers != 2:
        feat_spec_kwargs["pipeline_mode"] = pl.Buffered(feat_buffers)

    cost = pl.CostEstimate(
        flops=2 * B * Q * (E * H + 2 * S * H),
        transcendentals=B * Q * S,
        bytes_accessed=(B * S * H + B * Q * E) * in_itemsize
                       + B * Q * H * out_itemsize + B * S * 4
                       + E * H * in_itemsize + H * 4,
    )

    # Explicit scoped-VMEM limit (defaults: 16 MiB v5e / 32 MiB v6e,v7x); cap at
    # 48 MiB so large blocks still fit v7x's 64 MiB physical VMEM.
    vmem_limit = int(min(48 << 20, max(32 << 20, 1.5 * block_bytes_fn(Bb))))

    out = pl.pallas_call(
        atten_kernel,
        out_shape=jax.ShapeDtypeStruct((B, Q, H), out_dtype),
        grid_spec=pltpu.PrefetchScalarGridSpec(
            num_scalar_prefetch=0,
            grid=(grid,),
            in_specs=[
                pl.BlockSpec((Bb, Q, E), lambda i: (i, 0, 0)),      # ebd
                pl.BlockSpec((E, H), lambda i: (0, 0)),             # W (invariant)
                pl.BlockSpec((1, 1, H), lambda i: (0, 0, 0)),       # bias (invariant)
                pl.BlockSpec((Bb, S, H), lambda i: (i, 0, 0),
                             **feat_spec_kwargs),                   # features
                pl.BlockSpec((Bb, 1, S), lambda i: (i, 0, 0)),      # extended mask
            ],
            out_specs=pl.BlockSpec((Bb, Q, H), lambda i: (i, 0, 0)),
        ),
        compiler_params=pltpu.CompilerParams(
            dimension_semantics=("parallel",),     # batch-block axis -> 2 TCs on v7x
            vmem_limit_bytes=vmem_limit),
        cost_estimate=cost,
    )(ebd, w, b3, features, ext)

    return out.reshape(B, Q * H)


def atten_reference(features, ebd, attention_mask, w, b):
    B, S, H = features.shape
    attn = jnp.einsum("bqe,eh->bqh", ebd, w) + b
    ext = (1.0 - attention_mask[:, None, :].astype(features.dtype)) * -10000.0
    scores = jnp.einsum("bqh,bsh->bqs", attn, features) + ext
    scores = jax.nn.softmax(scores, axis=-1)
    out = jnp.einsum("bqs,bsh->bqh", scores, features)
    return out.reshape(B, -1)


if __name__ == "__main__":
    # Small, forward-consistent shapes.
    B, S, H = 8, 16, 32      # batch, seq_len, size (feature hidden)
    Q, E = 8, 32             # number of label queries, label_ebd dim

    key = jax.random.PRNGKey(0)
    k1, k2, k3, k4 = jax.random.split(key, 4)

    features = jax.random.normal(k1, (B, S, H), dtype=jnp.float32)
    ebd = jax.random.normal(k2, (B, Q, E), dtype=jnp.float32)
    # attention mask: 1 = attend, 0 = masked; varied valid lengths per row.
    lengths = jnp.array([S, S // 2, S, 3 * S // 4, S // 4, S, S // 2, 1])
    attention_mask = (jnp.arange(S)[None, :] < lengths[:, None]).astype(jnp.float32)

    # Deterministic "Trans" parameters (Linear E -> H).
    w = jax.random.normal(k3, (E, H), dtype=jnp.float32) * 0.05
    b = jax.random.normal(k4, (H,), dtype=jnp.float32) * 0.05

    ref = atten_reference(features, ebd, attention_mask, w, b)

    # Default path: auto block size, bf16 matmul operands, f32 accumulation.
    out_bf16 = atten_forward(features, ebd, attention_mask, w, b)
    out_bf16 = jax.block_until_ready(out_bf16)
    assert out_bf16.shape == (B, Q * H)
    assert jnp.allclose(out_bf16, ref, atol=5e-2, rtol=5e-2)

    # f32 operand path (tighter tolerance; approx reciprocal in the softmax
    # denominator keeps it slightly looser than 1e-4).
    out_f32 = atten_forward(features, ebd, attention_mask, w, b,
                            matmul_dtype=None, block_b=4)
    out_f32 = jax.block_until_ready(out_f32)
    assert jnp.allclose(out_f32, ref, atol=5e-3, rtol=5e-3)

    print("KERNEL_OK")
</pallas_src>

<mosaic_0001>
module attributes {stable_mosaic.version = 11 : i64} {
  func.func @atten_kernel(%arg0: i32, %arg1: memref<4x8x32xbf16, #tpu.memory_space<vmem>>, %arg2: memref<32x32xbf16, #tpu.memory_space<vmem>>, %arg3: memref<1x1x32xf32, #tpu.memory_space<vmem>>, %arg4: memref<4x16x32xbf16, #tpu.memory_space<vmem>>, %arg5: memref<4x1x16xf32, #tpu.memory_space<vmem>>, %arg6: memref<4x8x32xf32, #tpu.memory_space<vmem>>) attributes {dimension_semantics = [#tpu.dimension_semantics<parallel>], iteration_bounds = array<i64: 2>, scalar_prefetch = 0 : i64, scratch_operands = 0 : i64, tpu.core_type = #tpu.core_type<tc>, window_params = [{transform_indices = @transform_0, window_bounds = array<i64: 4, 8, 32>}, {pipeline_mode = #tpu.pipeline_mode<synchronous>, transform_indices = @transform_1, window_bounds = array<i64: 32, 32>}, {pipeline_mode = #tpu.pipeline_mode<synchronous>, transform_indices = @transform_2, window_bounds = array<i64: 1, 1, 32>}, {transform_indices = @transform_3, window_bounds = array<i64: 4, 16, 32>}, {transform_indices = @transform_4, window_bounds = array<i64: 4, 1, 16>}, {transform_indices = @transform_5, window_bounds = array<i64: 4, 8, 32>}]} {
    %c0 = arith.constant 0 : index
    %c0_0 = arith.constant 0 : index
    %c0_1 = arith.constant 0 : index
    %0 = vector.load %arg4[%c0, %c0_0, %c0_1] : memref<4x16x32xbf16, #tpu.memory_space<vmem>>, vector<4x16x32xbf16>
    %c0_2 = arith.constant 0 : index
    %c0_3 = arith.constant 0 : index
    %c0_4 = arith.constant 0 : index
    %1 = vector.load %arg5[%c0_2, %c0_3, %c0_4] : memref<4x1x16xf32, #tpu.memory_space<vmem>>, vector<4x1x16xf32>
    %c0_5 = arith.constant 0 : index
    %c0_6 = arith.constant 0 : index
    %c0_7 = arith.constant 0 : index
    %2 = vector.load %arg1[%c0_5, %c0_6, %c0_7] : memref<4x8x32xbf16, #tpu.memory_space<vmem>>, vector<4x8x32xbf16>
    %3 = vector.shape_cast %2 : vector<4x8x32xbf16> to vector<32x32xbf16>
    %c0_8 = arith.constant 0 : index
    %c0_9 = arith.constant 0 : index
    %4 = vector.load %arg2[%c0_8, %c0_9] : memref<32x32xbf16, #tpu.memory_space<vmem>>, vector<32x32xbf16>
    %cst = arith.constant dense<0.000000e+00> : vector<32x32xf32>
    %5 = tpu.matmul %3, %4, %cst {dimension_numbers = #tpu.dot_dimension_numbers<[1], [0], [0], [1], [0, 0, 1, 1], [], []>} : vector<32x32xbf16>, vector<32x32xbf16>, vector<32x32xf32> -> vector<32x32xf32>
    %6 = vector.shape_cast %5 : vector<32x32xf32> to vector<4x8x32xf32>
    %c0_10 = arith.constant 0 : index
    %c0_11 = arith.constant 0 : index
    %c0_12 = arith.constant 0 : index
    %7 = vector.load %arg3[%c0_10, %c0_11, %c0_12] : memref<1x1x32xf32, #tpu.memory_space<vmem>>, vector<1x1x32xf32>
    %8 = vector.broadcast %7 : vector<1x1x32xf32> to vector<4x8x32xf32>
    %9 = arith.addf %6, %8 : vector<4x8x32xf32>
    %10 = arith.truncf %9 : vector<4x8x32xf32> to vector<4x8x32xbf16>
    "tpu.trace_start"() <{level = 10 : i32, message = "bqh,bsh->bqs"}> : () -> ()
    %cst_13 = arith.constant dense<0.000000e+00> : vector<4x8x16xf32>
    %11 = tpu.matmul %10, %0, %cst_13 {dimension_numbers = #tpu.dot_dimension_numbers<[2], [2], [1], [1], [0, 0, 0, 1, 1, 1], [0], [0]>} : vector<4x8x32xbf16>, vector<4x16x32xbf16>, vector<4x8x16xf32> -> vector<4x8x16xf32>
    "tpu.trace_stop"() : () -> ()
    %12 = vector.broadcast %1 : vector<4x1x16xf32> to vector<4x8x16xf32>
    %13 = arith.addf %11, %12 : vector<4x8x16xf32>
    %cst_14 = arith.constant dense<0xFF800000> : vector<4x8xf32>
    %14 = vector.multi_reduction <maximumf>, %13, %cst_14 [2] : vector<4x8x16xf32> to vector<4x8xf32>
    %15 = vector.shape_cast %14 : vector<4x8xf32> to vector<4x8x1xf32>
    %16 = vector.broadcast %15 : vector<4x8x1xf32> to vector<4x8x16xf32>
    %17 = arith.subf %13, %16 : vector<4x8x16xf32>
    %18 = math.exp %17 : vector<4x8x16xf32>
    %cst_15 = arith.constant dense<0.000000e+00> : vector<4x8xf32>
    %19 = vector.multi_reduction <add>, %18, %cst_15 [2] : vector<4x8x16xf32> to vector<4x8xf32>
    %20 = vector.shape_cast %19 : vector<4x8xf32> to vector<4x8x1xf32>
    %21 = tpu.reciprocal %20 {approx = true} : vector<4x8x1xf32> -> vector<4x8x1xf32>
    %22 = vector.broadcast %21 : vector<4x8x1xf32> to vector<4x8x16xf32>
    %23 = arith.mulf %18, %22 : vector<4x8x16xf32>
    %24 = arith.truncf %23 : vector<4x8x16xf32> to vector<4x8x16xbf16>
    "tpu.trace_start"() <{level = 10 : i32, message = "bqs,bsh->bqh"}> : () -> ()
    %cst_16 = arith.constant dense<0.000000e+00> : vector<4x8x32xf32>
    %25 = tpu.matmul %24, %0, %cst_16 {dimension_numbers = #tpu.dot_dimension_numbers<[2], [1], [1], [2], [0, 0, 0, 1, 1, 2], [0], [0]>} : vector<4x8x16xbf16>, vector<4x16x32xbf16>, vector<4x8x32xf32> -> vector<4x8x32xf32>
    "tpu.trace_stop"() : () -> ()
    %c0_17 = arith.constant 0 : index
    %c0_18 = arith.constant 0 : index
    %c0_19 = arith.constant 0 : index
    %26 = vector.load %arg6[%c0_17, %c0_18, %c0_19] : memref<4x8x32xf32, #tpu.memory_space<vmem>>, vector<4x8x32xf32>
    tpu.vector_store %arg6[%c0_17, %c0_18, %c0_19], %25 {strides = array<i32>} : memref<4x8x32xf32, #tpu.memory_space<vmem>>, vector<4x8x32xf32>,
    return
  }
  func.func @transform_0(%arg0: i32) -> (i32, i32, i32) {
    %c0_i32 = arith.constant 0 : i32
    %c0_i32_0 = arith.constant 0 : i32
    %c0_i32_1 = arith.constant 0 : i32
    return %arg0, %c0_i32, %c0_i32_0 : i32, i32, i32
  }
  func.func @transform_1(%arg0: i32) -> (i32, i32) {
    %c0_i32 = arith.constant 0 : i32
    %c0_i32_0 = arith.constant 0 : i32
    %c0_i32_1 = arith.constant 0 : i32
    return %c0_i32, %c0_i32_0 : i32, i32
  }
  func.func @transform_2(%arg0: i32) -> (i32, i32, i32) {
    %c0_i32 = arith.constant 0 : i32
    %c0_i32_0 = arith.constant 0 : i32
    %c0_i32_1 = arith.constant 0 : i32
    %c0_i32_2 = arith.constant 0 : i32
    return %c0_i32, %c0_i32_0, %c0_i32_1 : i32, i32, i32
  }
  func.func @transform_3(%arg0: i32) -> (i32, i32, i32) {
    %c0_i32 = arith.constant 0 : i32
    %c0_i32_0 = arith.constant 0 : i32
    %c0_i32_1 = arith.constant 0 : i32
    return %arg0, %c0_i32, %c0_i32_0 : i32, i32, i32
  }
  func.func @transform_4(%arg0: i32) -> (i32, i32, i32) {
    %c0_i32 = arith.constant 0 : i32
    %c0_i32_0 = arith.constant 0 : i32
    %c0_i32_1 = arith.constant 0 : i32
    return %arg0, %c0_i32, %c0_i32_0 : i32, i32, i32
  }
  func.func @transform_5(%arg0: i32) -> (i32, i32, i32) {
    %c0_i32 = arith.constant 0 : i32
    %c0_i32_0 = arith.constant 0 : i32
    %c0_i32_1 = arith.constant 0 : i32
    return %arg0, %c0_i32, %c0_i32_0 : i32, i32, i32
  }
}

</mosaic_0001>

<bundles_post_ra>
// kernel: tpu_custom_call.1
= control target key start
LH: loop header
LB: loop body
LE: loop exit
PB: predicated region body
PF: predicated region fallthrough
CT: control target
= control target key end

     0   :  { %s1766_s0 = inlined_call_operand.hbm [shape: bf16[8,8,32], index: 0, kind: input, shape index: {}]   ;;  %s1767_s1 = inlined_call_operand.hbm [shape: bf16[32,32], index: 1, kind: input, shape index: {}]   ;;  %s1768_s2 = inlined_call_operand.vmem [shape: f32[1,1,32], index: 2, kind: input, shape index: {}]   ;;  %s1769_s3 = inlined_call_operand.hbm [shape: bf16[8,16,32], index: 3, kind: input, shape index: {}]   ;;  %s1770_s4 = inlined_call_operand.vmem [shape: f32[8,1,16], index: 4, kind: input, shape index: {}]   ;;  %s1771_s5 = inlined_call_operand.hbm [shape: f32[8,8,32], index: 5, kind: output, shape index: {}]  }
   0x1   :  { %1778 = sst [smem:[#allocation13_spill]] %s1766_s0 }
   0x2   :  { %10 = vsyncpa [#allocation3], 0 }
   0x3   :  { %12 = vsyncpa [#allocation3 + $0x1], 0 }
   0x4   :  { %13 = vsyncpa [#allocation6], 0 }
   0x5   :  { %14 = vsyncpa [#allocation4], 0 }
   0x6   :  { %16 = vsyncpa [#allocation4 + $0x1], 0  ;;  %s1436_s18 = smov 0   ;;  %s1438_s19 = smov 0  }
   0x7   :  { %s1440_s20 = smov 0   ;;  %s1442_s21 = smov 0  }
   0x8 LB: > { %s1457_s22 = sadd.s32 1, %s1394_s21   ;;  %s29_s23 = sadd.s32 1, %s1390_s20  ;;  %s1394_s21 = sphi %s1442_s21, %s1797_s21   ;;  %s1390_s20 = sphi %s1440_s20, %s1796_s20   ;;  %s1386_s19 = sphi %s1438_s19, %s1795_s19   ;;  %s1382_s18 = sphi %s1436_s18, %s1794_s18  }
   0x9   : > { %s26_s24 = ssub.s32 %s1394_s21, %s1457_s22  ;;  %p36_p0 = scmp.ne.s32.totalorder %s1390_s20, %s1386_s19 }
   0xa   : > { %p27_p1 = scmp.eq.s32.totalorder %s26_s24, 0  ;;  %p37_p2 = scmp.eq.s32.totalorder %s1394_s21, 0 }
   0xb   : > { %p1166_p5 = scmp.lt.s32.totalorder %s1394_s21, 2  ;;  %s202_s26 = sand.u32 1, %s1394_s21  }
   0xc   : > { %s1466_s25 = scalar_select %p27_p1, %s1390_s20, %s29_s23  }
   0xd   : > { %p38_p3 = por %p37_p2, %p36_p0  ;;  %s204_s27 = sand.u32 1, %s1390_s20  }
   0xe   : > { %s1019_s28 = sshll.u32 %s204_s27, 4  ;;  %s1060_s29 = sshll.u32 %s1394_s21, 8 }
   0xf   : > { %s1779_s0 = sld [smem:[#allocation13_spill]]  ;;  %s206_s8 = scalar_lea.vmem [#allocation2], %s1019_s28 }
  0x10   : > { %s213_s9 = sshll.u32 %s206_s8, 4  ;;  %p1481_p6 = pnand %p1166_p5, %p38_p3  ;;  %s1485_s9 = int_to_ptr.vmem [resolvable:$true] %s213_s9 }
  0x11   : > { %s1487_s11 = sshll.u32 %s204_s27, 5  ;;  %s1489_s12 = scalar_lea.sflag [#allocation3], %s202_s26 }
  0x12   : > { %p1234_p8 = pneg %p1481_p6 }
  0x15   : > { %s1479_s7 = scalar_lea.hbm %s1779_s0, %s1060_s29  ;;  %s1237_s16 = scalar_lea.hbm %s1779_s0, 512 }
  0x16   : > { %s1232_s13 = scalar_lea.hbm %s1479_s7, 256  ;;  %p1238_p11 = scmp.lt.u32.totalorder %s1479_s7, %s1779_s0 }
  0x17   : > { %p1233_p7 = scmp.ne.s32.totalorder %s1479_s7, %s1232_s13  ;;  %p1239_p12 = scmp.lt.u32.totalorder %s1237_s16, %s1232_s13 }
  0x18   : > { %p1241_p1 = scmp.lt.u32.totalorder %s1232_s13, %s1479_s7 }
  0x19   : > { %p1235_p9 = pnand %p1234_p8, %p1233_p7  ;;  %p1240_p13 = por %p1239_p12, %p1238_p11 }
  0x1b   : > { %p1236_p10 = pneg %p1235_p9  ;;  %p1242_p2 = por %p1241_p1, %p1240_p13 }
  0x1d   : > { %p1243_p3 = pnand %p1242_p2, %p1236_p10 }
  0x1f   : > { %1246 = shalt.err (!%p1243_p3)
}
  0x20   : > { %s1247_s24 = scalar_lea.vmem %s1485_s9, 256  ;;  %s1396_s26 = smov [#allocation2]  }
  0x21   : > { %p1248_p5 = scmp.ne.s32.totalorder %s1485_s9, %s1247_s24  ;;  %s1252_s27 = sshll.u32 %s1396_s26, 4  ;;  %s1253_s27 = int_to_ptr.vmem [resolvable:$false] %s1252_s27 }
  0x22   : > { %s1254_s28 = scalar_lea.vmem %s1253_s27, 512  ;;  %p1255_p4 = scmp.lt.s32.totalorder %s1485_s9, %s1253_s27 }
  0x23   : > { %p1250_p7 = pnand %p1248_p5, %p1234_p8  ;;  %p1256_p11 = scmp.lt.s32.totalorder %s1254_s28, %s1247_s24 }
  0x25   : > { %p1251_p9 = pneg %p1250_p7  ;;  %p1257_p12 = por %p1256_p11, %p1255_p4 }
  0x27   : > { %p1258_p13 = pnand %p1257_p12, %p1251_p9 }
  0x29   : > { %1261 = shalt.err (!%p1258_p13)
}
  0x2a   : > { %s1774_s29 = smov 64   ;;  %s1398_s30 = smov 4  }
  0x2b   : > { %1157 = dma.hbm_to_vmem [thread:$0]  (!%p1481_p6), %s1479_s7, 256, %s1485_s9, %s1489_s12, %s1774_s29, %s1774_s29, %s1398_s30  }
  0x2c   : > { %s1521_s6 = sadd.s32 4294967295, %s1394_s21   ;;  %s1015_s8 = sadd.s32 4294967294, %s1394_s21  }
  0x2d   : > { %p42_p4 = scmp.ne.s32.totalorder %s1386_s19, %s1382_s18  ;;  %p1772_p10 = scmp.eq.s32.totalorder %s1521_s6, 0 }
  0x2e   : > { %p160_p1 = scmp.eq.s32.totalorder %s1521_s6, 1  ;;  %p166_p2 = scmp.eq.s32.totalorder %s1015_s8, 1 }
  0x2f   : > { %p1016_p3 = scmp.ge.s32.totalorder %s1394_s21, 1  ;;  %p1531_p5 = por %p1772_p10, %p42_p4 }
  0x30   : > { %p1538_p7 = por %p160_p1, %p36_p0  ;;  %p1542_p9 = por %p166_p2, %p42_p4 }
  0x31   : > { %s1781_s13 = scalar_select %p1531_p5, 1, 0 }
  0x32   : > { %s1782_s7 = scalar_select %p1538_p7, 1, 0 }
  0x33   : > { %s1783_s9 = scalar_select %p1542_p9, 1, 0 }
  0x34   : > { %p173_p11 = scmp.lt.s32.totalorder %s1394_s21, 3  ;;  %s227_s14 = scalar_lea.vmem [#allocation7], %s1487_s11 }
  0x35   : > { %s235_s15 = sshll.u32 %s227_s14, 4  ;;  %s1399_s17 = smov [#allocation5]   ;;  %s1560_s15 = int_to_ptr.vmem [resolvable:$true] %s235_s15 }
  0x36   : > { %p1548_p12 = pnand %p1016_p3, %p173_p11  ;;  %s185_s23 = sshll.u32 %s1399_s17, 4  ;;  %s1562_s23 = int_to_ptr.vmem [resolvable:$true] %s185_s23 }
  0x37   : > { %s1062_s24 = sshll.u32 %s1394_s21, 9 }
  0x38   : > { %s1784_s16 = scalar_select %p1548_p12, 1, 0 }
  0x39   : > { %p1150_p0 = pneg %p1548_p12  ;;  %s1558_s28 = scalar_lea.hbm %s1769_s3, %s1062_s24 }
  0x3a   : > { %s1262_s8 = scalar_lea.hbm %s1558_s28, 512  ;;  %s1267_s24 = scalar_lea.hbm %s1769_s3, 1024 }
  0x3b   : > { %p1566_p13 = pnand %p1150_p0, %p1772_p10  ;;  %p1263_p4 = scmp.ne.s32.totalorder %s1558_s28, %s1262_s8 }
  0x3c   : > { %p1268_p3 = scmp.lt.u32.totalorder %s1558_s28, %s1769_s3  ;;  %p1269_p11 = scmp.lt.u32.totalorder %s1267_s24, %s1262_s8 }
  0x3d   : > { %p1265_p1 = pnand %p1263_p4, %p1234_p8  ;;  %p1271_p0 = scmp.lt.u32.totalorder %s1262_s8, %s1558_s28 }
  0x3e   : > { %p1270_p9 = por %p1269_p11, %p1268_p3 }
  0x3f   : > { %p1266_p2 = pneg %p1265_p1 }
  0x40   : > { %p1272_p10 = por %p1271_p0, %p1270_p9 }
  0x42   : > { %p1273_p7 = pnand %p1272_p10, %p1266_p2 }
  0x44   : > { %1276 = shalt.err (!%p1273_p7)
}
  0x45   : > { %s1277_s29 = scalar_lea.vmem %s1560_s15, 512  ;;  %s1400_s14 = smov [#allocation7]  }
  0x46   : > { %p1278_p4 = scmp.ne.s32.totalorder %s1560_s15, %s1277_s29  ;;  %s1282_s17 = sshll.u32 %s1400_s14, 4  ;;  %s1283_s17 = int_to_ptr.vmem [resolvable:$false] %s1282_s17 }
  0x47   : > { %s1284_s26 = scalar_lea.vmem %s1283_s17, 1024  ;;  %p1285_p12 = scmp.lt.s32.totalorder %s1560_s15, %s1283_s17 }
  0x48   : > { %p1280_p1 = pnand %p1278_p4, %p1234_p8  ;;  %p1286_p3 = scmp.lt.s32.totalorder %s1284_s26, %s1277_s29 }
  0x4a   : > { %p1281_p5 = pneg %p1280_p1  ;;  %p1287_p11 = por %p1286_p3, %p1285_p12 }
  0x4c   : > { %p1288_p9 = pnand %p1287_p11, %p1281_p5 }
  0x4e   : > { %1291 = shalt.err (!%p1288_p9)
}
  0x4f   : > { %s1786_s8 = smov 64   ;;  %s1292_s14 = scalar_lea.hbm %s1767_s1, 256 }
  0x50   : > { %1160 = dma.hbm_to_vmem [thread:$0]  (!%p1481_p6), %s1558_s28, 512, %s1560_s15, %s1489_s12, %s1786_s8, %s1786_s8, %s1398_s30  }
  0x51   : > { %p1293_p8 = scmp.ne.s32.totalorder %s1767_s1, %s1292_s14  ;;  %p1294_p10 = pneg %p1566_p13 }
  0x52   : > { %p1299_p12 = scmp.lt.u32.totalorder %s1292_s14, %s1767_s1 }
  0x53   : > { %p1295_p5 = pnand %p1294_p10, %p1293_p8 }
  0x55   : > { %p1296_p7 = pneg %p1295_p5 }
  0x57   : > { %p1301_p2 = pnand %p1299_p12, %p1296_p7 }
  0x59   : > { %1304 = shalt.err (!%p1301_p2)
}
  0x5a   : > { %s1305_s12 = scalar_lea.vmem %s1562_s23, 256  ;;  %p1313_p1 = scmp.lt.s32.totalorder %s1562_s23, %s1562_s23 }
  0x5b   : > { %p1306_p6 = scmp.ne.s32.totalorder %s1562_s23, %s1305_s12  ;;  %p1314_p3 = scmp.lt.s32.totalorder %s1305_s12, %s1305_s12 }
  0x5d   : > { %p1308_p0 = pnand %p1306_p6, %p1294_p10  ;;  %p1315_p11 = por %p1314_p3, %p1313_p1 }
  0x5f   : > { %p1309_p4 = pneg %p1308_p0 }
  0x61   : > { %p1316_p9 = pnand %p1315_p11, %p1309_p4 }
  0x63   : > { %1319 = shalt.err (!%p1316_p9)
}
  0x64   : > { %1153 = dma.hbm_to_vmem [thread:$0]  (!%p1566_p13), %s1767_s1, 256, %s1562_s23, [#allocation6], %s1786_s8, %s1786_s8, %s1398_s30  }
  0x65   : > { %p1787_p8 = scmp.ne.s32.totalorder %s1784_s16, 0 }
  0x66   : > { %s257_s28 = sand.u32 (!%p1787_p8), 1, %s1521_s6   ;;  %s1625_s26 = sand.u32 (!%p1787_p8), 1, %s1386_s19  }
  0x67   : > { %255 = sbr.rel (%p1787_p8) target bundleno = 1113 (0x459), region = 40  ;;  %s1027_s24 = sshll.u32 (!%p1787_p8), %s1625_s26, 4 }
  0x68   : > { %s258_s11 = scalar_lea.sflag (!%p1787_p8), [#allocation3], %s257_s28  ;;  %s261_s27 = scalar_lea.vmem (!%p1787_p8), [#allocation2], %s1027_s24 }
  0x69   : > { %p1788_p10 = scmp.ne.s32.totalorder (!%p1787_p8), %s1781_s13, 0 }
  0x6e   : > { %1365 = dma.done.wait (%p1788_p10), %s258_s11, 256  }
  0x6f   : > { %1367 = vsyncadd (%p1788_p10), %s258_s11, 4294967040  ;;  %p1789_p13 = scmp.eq.s32.totalorder %s1521_s6, 0 }
  0x71   : > { %1369 = dma.done.wait (%p1789_p13), [#allocation6], 256   ;;  %p1790_p5 = pmov %p1789_p13 }
  0x72   : > { %s1029_s30 = sshll.u32 %s1625_s26, 5 }
  0x73   : > { %1371 = vsyncadd (%p1790_p5), [#allocation6], 4294967040  ;;  %s1639_s16 = scalar_lea.vmem [#allocation7], %s1029_s30 }
  0x74   : > { %1373 = dma.done.wait (%p1788_p10), %s258_s11, 512  }
  0x75   : > { %1375 = vsyncadd (%p1788_p10), %s258_s11, 4294966784  ;;  %v1401_v0 = vmov 0.0   ;;  %v1208_v1 = vld [vmem:[#allocation5] sm:$0xff]   ;;  %v1209_v2 = vld [vmem:[#allocation5 + $0x8] sm:$0xff]   ;;  %vm361_vm0 = vcmask 261120   ;;  %vm1402_vm1 = vmmov 0  }
  0x76   : > { %1092 = vmatprep.subr.bf16.mxu1 %v1401_v0  ;;  %1084 = vmatprep.subr.bf16.mxu0 %v1208_v1  ;;  %v1210_v3 = vld [vmem:[%s261_s27] sm:$0xff]   ;;  %v1211_v5 = vld [vmem:[%s261_s27 + $0x8] sm:$0xff]   ;;  %s1031_s8 = sshll.u32 %s1521_s6, 2  ;;  %vm660_vm2 = vcmask 130048   ;;  %s309_s29 = scalar_lea.vmem [#allocation8], %s1029_s30 }
  0x77   : > { %1085 = vmatpush3.bf16.msra.mxu0 %v1208_v1  ;;  %1088 = vmatprep.mubr.msk.bf16.mxu0 %vm361_vm0, %v1210_v3  ;;  %v1212_v4 = vld [vmem:[%s1639_s16] sm:$0xff]   ;;  %v1213_v7 = vld [vmem:[%s1639_s16 + $0x8] sm:$0xff]   ;;  %v1038_v9 = vld [vmem:[%s1768_s2] ss:$0 sm:$0xff]  ;;  %p313_p7 = scmp.lt.s32.totalorder %s1031_s8, 7  ;;  %s903_s12 = sshll.u32 %s309_s29, 4  ;;  %s1715_s12 = int_to_ptr.vmem [resolvable:$true] %s903_s12 }
  0x78   : > { %1086 = vmatprep.subr.bf16.mxu0 %v1209_v2  ;;  %v465_v6 = vsel %vm361_vm0, %v1212_v4, 0  ;;  %v516_v8 = vsel %vm361_vm0, %v1213_v7, 0  ;;  %1094 = vmatprep.mubr.msk.bf16.mxu1 %vm1402_vm1, %v1401_v0  ;;  %v1663_v11 = vld [vmem:[%s1639_s16 + $0x10] sm:$0xff]   ;;  %v1666_v15 = vld [vmem:[%s1639_s16 + $0x18] sm:$0xff]   ;;  %s1063_s0 = sshll.u32 %s1521_s6, 9  ;;  %s890_s6 = scalar_lea.sflag [#allocation4], %s1625_s26 }
  0x79   : > { %1093 = vmatpush3.bf16.xpose.msra.mxu1 %v465_v6  ;;  %v567_v19 = vsel %vm361_vm0, %v1663_v11, 0  ;;  %v618_v21 = vsel %vm361_vm0, %v1666_v15, 0  ;;  %s1799_s8 = smov (!%p313_p7, %s1031_s8), 7  ;;  %s1721_s24 = scalar_lea.hbm %s1771_s5, %s1063_s0 }
  0x7a   : > { %1104 = vmatprep.subr.bf16.mxu1 %v1401_v0  ;;  %s315_s10 = scalar_lea.vmem %s1770_s4, %s1799_s8  ;;  %s1320_s11 = scalar_lea.vmem %s1715_s12, 512 }
  0x7b   : > { %1087 = vmatpush3.bf16.msra.mxu0 %v1209_v2  ;;  %v1039_v26 = vld [vmem:[%s315_s10] ss:$0 sm:$0xff]  ;;  %v1040_v28 = vld [vmem:[%s315_s10 + $0x1] ss:$0 sm:$0xff]  ;;  %v1041_v39 = vld [vmem:[%s315_s10 + $0x2] ss:$0 sm:$0xff]  ;;  %p1321_p12 = scmp.ne.s32.totalorder %s1715_s12, %s1320_s11 }
  0x7c   : > { %1098 = vmatprep.subr.bf16.mxu0 %v1401_v0  ;;  %v1042_v42 = vld [vmem:[%s315_s10 + $0x3] ss:$0 sm:$0xff]  ;;  %p1791_p2 = scmp.ne.s32.totalorder %s1782_s7, 0  ;;  %s1403_s27 = smov [#allocation8]  }
  0x7d   : > { %s1324_s30 = sshll.u32 %s1403_s27, 4  ;;  %s1325_s30 = int_to_ptr.vmem [resolvable:$false] %s1324_s30 }
  0x7e   : > { %1089 = vmatmul.mubr.msk.bf16.vlgmr.msra.gmra.mrb[0].mxu0 %vm361_vm0, %v1211_v5  ;;  %p1322_p6 = pnand %p1321_p12, %p1791_p2  ;;  %s1326_s16 = scalar_lea.vmem %s1325_s30, 1024 }
  0x7f   : > { %1100 = vmatprep.mubr.msk.bf16.mxu0 %vm1402_vm1, %v1401_v0  ;;  %p1327_p4 = scmp.lt.s32.totalorder %s1715_s12, %s1325_s30  ;;  %p1328_p1 = scmp.lt.s32.totalorder %s1326_s16, %s1320_s11 }
  0x80   : > { %p1323_p0 = pneg %p1322_p6 }
  0x81   : > { %p1329_p3 = por %p1328_p1, %p1327_p4 }
  0x83   : > { %p1330_p11 = pnand %p1329_p3, %p1323_p0 }
  0x84   : > { %1099 = vmatpush3.bf16.xpose.msra.mxu0 %v516_v8 }
  0x85   : > { %1110 = vmatprep.subr.bf16.mxu0 %v1401_v0 }
 0x151   : > { %v1090_v10 = vpop.f32.mrb[0].mxu0 }
 0x152   : > { %v402_v12 = vpop.f32.mrb[1].mxu0  ;;  %v426_v22 = vadd.f32 %v1090_v10, %v1038_v9 }
 0x153   : > { %v424_v13 = vadd.f32 %v1038_v9, %v402_v12  ;;  %v1091_v14 = vpop.f32.mrb[2].mxu0 }
 0x154   : > { %v405_v16 = vpop.f32.mrb[3].mxu0  ;;  %v427_v23 = vadd.f32 %v1091_v14, %v1038_v9  ;;  %v430_v24 = vpack.c.bf16 %v426_v22, %v426_v22 }
 0x155   : > { %v428_v17 = vpack.c.bf16 %v424_v13, %v424_v13  ;;  %v425_v18 = vadd.f32 %v1038_v9, %v405_v16 }
 0x156   : > { %v431_v25 = vpack.c.bf16 %v427_v23, %v427_v23 }
 0x157   : > { %v429_v20 = vpack.c.bf16 %v425_v18, %v425_v18  ;;  %1095 = vmatmul.mubr.msk.bf16.vlgmr.msra.gmra.mrb[0].mxu1 %vm361_vm0, %v428_v17 }
 0x158   : > { %1105 = vmatpush3.bf16.xpose.msra.mxu1 %v567_v19  ;;  %1106 = vmatprep.mubr.msk.bf16.mxu1 %vm1402_vm1, %v1401_v0 }
 0x159   : > { %1101 = vmatmul.mubr.msk.bf16.vlgmr.msra.gmra.mrb[4].mxu0 %vm361_vm0, %v429_v20  ;;  %1116 = vmatprep.subr.bf16.mxu1 %v1401_v0 }
 0x15a   : > { %1111 = vmatpush3.bf16.xpose.msra.mxu0 %v618_v21  ;;  %1112 = vmatprep.mubr.msk.bf16.mxu0 %vm1402_vm1, %v1401_v0 }
 0x15b   : > { %1122 = vmatprep.subr.bf16.mxu0 %v1401_v0 }
 0x15f   : > { %1107 = vmatmul.mubr.msk.bf16.vlgmr.msra.gmra.mrb[4].mxu1 %vm361_vm0, %v430_v24 }
 0x160   : > { %1117 = vmatpush3.bf16.msra.mxu1 %v1212_v4  ;;  %1118 = vmatprep.mubr.msk.bf16.mxu1 %vm1402_vm1, %v1401_v0 }
 0x161   : > { %1113 = vmatmul.mubr.msk.bf16.vlgmr.msra.gmra.mrb[8].mxu0 %vm361_vm0, %v431_v25  ;;  %1128 = vmatprep.subr.bf16.mxu1 %v1401_v0 }
 0x162   : > { %1123 = vmatpush3.bf16.msra.mxu0 %v1213_v7  ;;  %1124 = vmatprep.mubr.msk.bf16.mxu0 %vm1402_vm1, %v1401_v0 }
 0x163   : > { %1134 = vmatprep.subr.bf16.mxu0 %v1401_v0 }
 0x22a   : > { %v501_v27 = vpop.f32.mrb[0].mxu1 }
 0x22b   : > { %v502_v29 = vadd.f32 %v1039_v26, %v501_v27  ;;  %v1096_v30 = vpop.f32.mrb[1].mxu1 }
 0x22c   : > { %v504_v31 = vpop.f32.mrb[2].mxu1  ;;  %v552_v32 = vpop.f32.mrb[4].mxu0 }
 0x22d   : > { %v553_v33 = vadd.f32 %v1040_v28, %v552_v32  ;;  %v1097_v34 = vpop.f32.mrb[3].mxu1  ;;  %v1102_v35 = vpop.f32.mrb[5].mxu0  ;;  %v661_v36 = vsel %vm660_vm2, %v502_v29, -inf }
 0x22e   : > { %v555_v37 = vpop.f32.mrb[6].mxu0  ;;  %662 = vmax.xlane.f32.xlu0 %v661_v36 }
 0x22f   : > { %v1103_v38 = vpop.f32.mrb[7].mxu0  ;;  %v664_v40 = vsel %vm660_vm2, %v553_v33, -inf }
 0x232   : > { %665 = vmax.xlane.f32.xlu0 %v664_v40  ;;  %v603_v41 = vpop.f32.mrb[4].mxu1 }
 0x233   : > { %v604_v43 = vadd.f32 %v1041_v39, %v603_v41  ;;  %v1108_v44 = vpop.f32.mrb[5].mxu1 }
 0x234   : > { %v606_v45 = vpop.f32.mrb[6].mxu1  ;;  %v654_v46 = vpop.f32.mrb[8].mxu0 }
 0x235   : > { %v655_v47 = vadd.f32 %v1042_v42, %v654_v46  ;;  %v1109_v48 = vpop.f32.mrb[7].mxu1  ;;  %v1114_v49 = vpop.f32.mrb[9].mxu0  ;;  %v667_v50 = vsel %vm660_vm2, %v604_v43, -inf }
 0x236   : > { %v657_v51 = vpop.f32.mrb[10].mxu0  ;;  %668 = vmax.xlane.f32.xlu1 %v667_v50 }
 0x237   : > { %v1115_v52 = vpop.f32.mrb[11].mxu0  ;;  %v670_v53 = vsel %vm660_vm2, %v655_v47, -inf }
 0x23a   : > { %671 = vmax.xlane.f32.xlu1 %v670_v53 }
 0x2bb   : > { %v663_v54 = vpop.xlane.xlu0 %662 }
 0x2bc   : > { %v673_v55 = vsub.f32 %v502_v29, %v663_v54 }
 0x2be   : > { %v677_v56 = vmul.f32 1.442695, %v673_v55 }
 0x2bf   : > { %v666_v57 = vpop.xlane.xlu0 %665 }
 0x2c0   : > { %1216 = vpow2.f32 %v677_v56  ;;  %v674_v58 = vsub.f32 %v553_v33, %v666_v57 }
 0x2c2   : > { %v679_v59 = vmul.f32 1.442695, %v674_v58 }
 0x2c3   : > { %v669_v60 = vpop.xlane.xlu1 %668 }
 0x2c4   : > { %1218 = vpow2.f32 %v679_v59  ;;  %v675_v61 = vsub.f32 %v604_v43, %v669_v60 }
 0x2c6   : > { %v681_v62 = vmul.f32 1.442695, %v675_v61 }
 0x2c7   : > { %v672_v63 = vpop.xlane.xlu1 %671 }
 0x2c8   : > { %1220 = vpow2.f32 %v681_v62  ;;  %v676_v1 = vsub.f32 %v655_v47, %v672_v63 }
 0x2ca   : > { %v1217_v2 = vpop.eup %1216  ;;  %v683_v3 = vmul.f32 1.442695, %v676_v1 }
 0x2cb   : > { %v685_v4 = vsel %vm660_vm2, %v1217_v2, 0.0 }
 0x2cc   : > { %1222 = vpow2.f32 %v683_v3  ;;  %686 = vadd.xlane.f32.xlu0 %v685_v4 }
 0x2ce   : > { %v1219_v5 = vpop.eup %1218 }
 0x2cf   : > { %v688_v6 = vsel %vm660_vm2, %v1219_v5, 0.0 }
 0x2d0   : > { %689 = vadd.xlane.f32.xlu1 %v688_v6 }
 0x2d2   : > { %v1221_v7 = vpop.eup %1220 }
 0x2d3   : > { %v691_v8 = vsel %vm660_vm2, %v1221_v7, 0.0 }
 0x2d4   : > { %692 = vadd.xlane.f32.xlu0 %v691_v8 }
 0x2d6   : > { %v1223_v9 = vpop.eup %1222 }
 0x2d7   : > { %v694_v10 = vsel %vm660_vm2, %v1223_v9, 0.0 }
 0x2d8   : > { %695 = vadd.xlane.f32.xlu1 %v694_v10 }
 0x359   : > { %v687_v12 = vpop.xlane.xlu0 %686 }
 0x35a   : > { %1224 = vrcp.f32 %v687_v12 }
 0x35d   : > { %v690_v13 = vpop.xlane.xlu1 %689 }
 0x35e   : > { %1226 = vrcp.f32 %v690_v13 }
 0x361   : > { %v693_v14 = vpop.xlane.xlu0 %692 }
 0x362   : > { %1228 = vrcp.f32 %v693_v14 }
 0x364   : > { %v1225_v16 = vpop.eup %1224 }
 0x365   : > { %v701_v17 = vmul.f32 %v1225_v16, %v1217_v2  ;;  %v696_v18 = vpop.xlane.xlu1 %695 }
 0x366   : > { %1230 = vrcp.f32 %v696_v18 }
 0x367   : > { %v705_v19 = vpack.c.bf16 %v701_v17, %v701_v17 }
 0x368   : > { %v1227_v20 = vpop.eup %1226 }
 0x369   : > { %v702_v21 = vmul.f32 %v1227_v20, %v1219_v5  ;;  %1119 = vmatmul.mubr.msk.bf16.vlgmr.msra.gmra.mrb[8].mxu1 %vm660_vm2, %v705_v19 }
 0x36a   : > { %1129 = vmatpush3.bf16.msra.mxu1 %v1663_v11  ;;  %1130 = vmatprep.mubr.msk.bf16.mxu1 %vm1402_vm1, %v1401_v0 }
 0x36b   : > { %v706_v22 = vpack.c.bf16 %v702_v21, %v702_v21 }
 0x36c   : > { %v1229_v23 = vpop.eup %1228 }
 0x36d   : > { %v703_v24 = vmul.f32 %v1229_v23, %v1221_v7  ;;  %1125 = vmatmul.mubr.msk.bf16.vlgmr.msra.gmra.mrb[12].mxu0 %vm660_vm2, %v706_v22 }
 0x36e   : > { %1135 = vmatpush3.bf16.msra.mxu0 %v1666_v15  ;;  %1136 = vmatprep.mubr.msk.bf16.mxu0 %vm1402_vm1, %v1401_v0 }
 0x36f   : > { %v707_v25 = vpack.c.bf16 %v703_v24, %v703_v24 }
 0x370   : > { %v1231_v26 = vpop.eup %1230 }
 0x371   : > { %v704_v27 = vmul.f32 %v1231_v26, %v1223_v9  ;;  %1131 = vmatmul.mubr.msk.bf16.vlgmr.msra.gmra.mrb[12].mxu1 %vm660_vm2, %v707_v25 }
 0x373   : > { %v708_v11 = vpack.c.bf16 %v704_v27, %v704_v27 }
 0x375   : > { %1137 = vmatmul.mubr.msk.bf16.vlgmr.msra.gmra.mrb[16].mxu0 %vm660_vm2, %v708_v11 }
 0x43c   : > { %v747_v28 = vpop.f32.mrb[8].mxu1 }
 0x43d   : > { %885 = vst.msk [vmem:[%s309_s29] sm:$0xff] %vm361_vm0, %v747_v28  ;;  %v1120_v29 = vpop.f32.mrb[9].mxu1 }
 0x43e   : > { %v750_v30 = vpop.f32.mrb[10].mxu1 }
 0x43f   : > { %v1121_v15 = vpop.f32.mrb[11].mxu1 }
 0x440   : > { %v791_v31 = vpop.f32.mrb[12].mxu0 }
 0x441   : > { %886 = vst.msk [vmem:[%s309_s29 + $0x8] sm:$0xff] %vm361_vm0, %v791_v31  ;;  %v1126_v0 = vpop.f32.mrb[13].mxu0 }
 0x442   : > { %v794_v32 = vpop.f32.mrb[14].mxu0 }
 0x443   : > { %v1127_v33 = vpop.f32.mrb[15].mxu0 }
 0x444   : > { %v835_v34 = vpop.f32.mrb[12].mxu1 }
 0x445   : > { %887 = vst.msk [vmem:[%s309_s29 + $0x10] sm:$0xff] %vm361_vm0, %v835_v34  ;;  %v1132_v35 = vpop.f32.mrb[13].mxu1 }
 0x446   : > { %v838_v36 = vpop.f32.mrb[14].mxu1 }
 0x447   : > { %v1133_v37 = vpop.f32.mrb[15].mxu1 }
 0x448   : > { %v879_v38 = vpop.f32.mrb[16].mxu0 }
 0x449   : > { %888 = vst.msk [vmem:[%s309_s29 + $0x18] sm:$0xff] %vm361_vm0, %v879_v38  ;;  %v1138_v39 = vpop.f32.mrb[17].mxu0 }
 0x44a   : > { %v882_v40 = vpop.f32.mrb[18].mxu0 }
 0x44b   : > { %1333 = shalt.err (!%p1330_p11)
}
 0x44c   : > { %s1334_s13 = scalar_lea.hbm %s1721_s24, 512  ;;  %s1338_s14 = scalar_lea.hbm %s1771_s5, 1024 }
 0x44d   : > { %p1335_p9 = scmp.ne.s32.totalorder %s1721_s24, %s1334_s13  ;;  %p1339_p13 = scmp.lt.u32.totalorder %s1721_s24, %s1771_s5 }
 0x44e   : > { %p1340_p5 = scmp.lt.u32.totalorder %s1338_s14, %s1334_s13  ;;  %p1342_p12 = scmp.lt.u32.totalorder %s1334_s13, %s1721_s24 }
 0x44f   : > { %p1336_p8 = pnand %p1335_p9, %p1791_p2 }
 0x450   : > { %p1341_p7 = por %p1340_p5, %p1339_p13 }
 0x451   : > { %p1337_p10 = pneg %p1336_p8 }
 0x452   : > { %p1343_p6 = por %p1342_p12, %p1341_p7 }
 0x454   : > { %p1344_p0 = pnand %p1343_p6, %p1337_p10 }
 0x456   : > { %1347 = shalt.err (!%p1344_p0)
}
 0x457   : > { %s1404_s29 = smov 128   ;;  %s1405_s0 = smov 8   ;;  %v1139_v41 = vpop.f32.mrb[19].mxu0 }
 0x458   : > { %1148 = dma.vmem_to_hbm [thread:$0]  (%p1791_p2), %s1715_s12, 512, %s1721_s24, %s890_s6, %s1404_s29, %s1404_s29, %s1405_s0  }
 0x459 PF: > { %s918_s15 = sand.u32 1, %s1382_s18   ;;  %p1792_p4 = scmp.ne.s32.totalorder %s1783_s9, 0 }
 0x45a   : > { %p1793_p1 = scmp.ge.s32.totalorder %s1394_s21, 2  ;;  %s919_s28 = scalar_lea.sflag [#allocation4], %s918_s15 }
 0x45c   : > { %p1162_p3 = pnand %p1793_p1, %p1792_p4 }
 0x45e   : > { %1377 = dma.done.wait (!%p1162_p3), %s919_s28, 512  }
 0x45f   : > { %1379 = vsyncadd (!%p1162_p3), %s919_s28, 4294966784  ;;  %p19_p11 = scmp.ge.s32.totalorder %s1457_s22, 4   ;;  %s1794_s18 = smov %s1386_s19 }
 0x460   : > { %s1795_s19 = smov %s1390_s20  ;;  %s1796_s20 = smov %s1466_s25 }
 0x461   : > { %s1797_s21 = smov %s1457_s22  ;;  %21 = sbr.rel (!%p19_p11) target bundleno = 8 (0x8), region = 103 }
 0x468   :  { %924 = vsyncpa [#allocation3], 1 }
 0x469   :  { %926 = vsyncpa [#allocation3 + $0x1], 1 }
 0x46a   :  { %927 = vsyncpa [#allocation6], 1 }
 0x46b   :  { %928 = vsyncpa [#allocation4], 1 }
 0x46c   :  { %930 = vsyncpa [#allocation4 + $0x1], 1 }

</bundles_post_ra>
